<compile_context>
chip_gen: v7x
topology: tpu7x:2x2x1
jax: 0.10.0
libtpu: 0.0.40
codegen_flags: <defaults>
</compile_context>

<pallas_src>
import math
import functools

import numpy as np
import jax
import jax.numpy as jnp
from jax.experimental import pallas as pl
from jax.experimental.pallas import tpu as pltpu


def _round_up(x, m):
    return ((x + m - 1) // m) * m


# ----------------------------- one-time parameter preparation -----------------------------
def prepare_attention_params(params):
    """Fuse K/V projections, fold the post-softmax 1/sqrt(H) scale into V, zero-pad the lane
    dims (H, Dout) to multiples of 128 and cast weights to bf16.  Run once, reuse every call."""
    wq, bq = params["wq"], params["bq"]
    wk, bk = params["wk"], params["bk"]
    wv, bv = params["wv"], params["bv"]
    H = wq.shape[1]
    Dout = wv.shape[1]
    Hpad = _round_up(H, 128)
    DoutPad = _round_up(Dout, 128)
    inv_sqrt_h = 1.0 / math.sqrt(H)

    def pad_cols(w, to):
        return jnp.pad(w, ((0, 0), (0, to - w.shape[1])))

    wq_p = pad_cols(wq, Hpad).astype(jnp.bfloat16)                       # (Din, Hpad)
    bq_p = jnp.pad(bq, (0, Hpad - H)).reshape(1, Hpad).astype(jnp.float32)

    wkv_p = jnp.concatenate(
        [pad_cols(wk, Hpad), pad_cols(wv * inv_sqrt_h, DoutPad)], axis=1
    ).astype(jnp.bfloat16)                                               # (Dkv, Hpad+DoutPad)
    bkv_p = jnp.concatenate(
        [jnp.pad(bk, (0, Hpad - H)), jnp.pad(bv * inv_sqrt_h, (0, DoutPad - Dout))]
    ).reshape(1, Hpad + DoutPad).astype(jnp.float32)

    return {"wq": wq_p, "bq": bq_p, "wkv": wkv_p, "bkv": bkv_p,
            "H": H, "Hpad": Hpad, "Dout": Dout, "DoutPad": DoutPad}


# --------------------------------- fused attention kernel ---------------------------------
def _attention_intent_kernel(x_ref, y_ref, wq_ref, bq_ref, wkv_ref, bkv_ref, o_ref, *,
                             seq_lens, offsets, nq, hpad):
    # Row-dense 2-D projections over ALL query rows and ALL flat key/value rows
    # (one wide MXU pass each instead of one tiny matmul per sentence).
    xq = x_ref[...].astype(jnp.bfloat16)                                  # (B*Nq, Din)
    q = jnp.dot(xq, wq_ref[...], preferred_element_type=jnp.float32) + bq_ref[...]   # (B*Nq, Hpad) f32

    yk = y_ref[...].astype(jnp.bfloat16)                                  # (T, Dkv)
    kv = jnp.dot(yk, wkv_ref[...], preferred_element_type=jnp.float32) + bkv_ref[...]  # (T, Hpad+DoutPad)
    bkv = bkv_ref[...]                                                    # (1, Hpad+DoutPad)

    lk = seq_lens[0]  # recover() uses seq_lens[0] as the padded key length
    for i, li in enumerate(seq_lens):        # static unroll; B is small and shapes are static
        off = offsets[i]
        qi = q[i * nq:i * nq + li]           # only the first li query rows survive the final concat
        kvi = kv[off:off + li]
        if li < lk:
            # recover(): zero-padded key rows project to bias-only rows; they still take part
            # in the softmax, exactly like the reference.
            kvi = jnp.concatenate(
                [kvi, jnp.broadcast_to(bkv, (lk - li, bkv.shape[-1]))], axis=0)
        ki = kvi[:, :hpad]                   # (lk, Hpad)
        vi = kvi[:, hpad:]                   # (lk, DoutPad)  -- already scaled by 1/sqrt(H)

        s = jax.lax.dot_general(qi.astype(jnp.bfloat16), ki.astype(jnp.bfloat16),
                                (((1,), (1,)), ((), ())),
                                preferred_element_type=jnp.float32)       # (li, lk)
        # Reference order: softmax FIRST; the 1/sqrt(H) scale is folded into V.
        p = jax.nn.softmax(s, axis=-1)
        oi = jnp.dot(p.astype(jnp.bfloat16), vi.astype(jnp.bfloat16),
                     preferred_element_type=jnp.float32)                  # (li, DoutPad)
        o_ref[off:off + li, :] = oi.astype(o_ref.dtype)


def attention_intent_forward(prepared, input_x, input_y, seq_lens):
    """AttentionIntent.forward (eval mode).  seq_lens must be static python ints."""
    seq_lens = [int(l) for l in seq_lens]
    assert all(l > 0 for l in seq_lens), "empty sentences are not supported"
    assert seq_lens[0] == max(seq_lens), "recover() assumes seq_lens[0] is the max length"

    B = len(seq_lens)
    Nq, Din = input_x.shape[1], input_x.shape[2]
    T = sum(seq_lens)
    Dkv = input_y.shape[-1]
    offsets = tuple(int(o) for o in np.concatenate([[0], np.cumsum(seq_lens)[:-1]]))

    Hpad, DoutPad, Dout = prepared["Hpad"], prepared["DoutPad"], prepared["Dout"]

    x_flat = input_x.reshape(B * Nq, Din)   # contiguous reshape (free)

    kernel = functools.partial(_attention_intent_kernel,
                               seq_lens=tuple(seq_lens), offsets=offsets,
                               nq=Nq, hpad=Hpad)

    out = pl.pallas_call(
        kernel,
        grid=(1,),  # whole (tiny) batch in one step; per-step fixed overhead paid once
        in_specs=[
            pl.BlockSpec((B * Nq, Din), lambda i: (0, 0)),
            pl.BlockSpec((T, Dkv), lambda i: (0, 0)),
            pl.BlockSpec((Din, Hpad), lambda i: (0, 0)),
            pl.BlockSpec((1, Hpad), lambda i: (0, 0)),
            pl.BlockSpec((Dkv, Hpad + DoutPad), lambda i: (0, 0)),
            pl.BlockSpec((1, Hpad + DoutPad), lambda i: (0, 0)),
        ],
        out_specs=pl.BlockSpec((T, DoutPad), lambda i: (0, 0)),
        out_shape=jax.ShapeDtypeStruct((T, DoutPad), jnp.float32),
        compiler_params=pltpu.CompilerParams(dimension_semantics=("arbitrary",)),
    )(x_flat, input_y, prepared["wq"], prepared["bq"], prepared["wkv"], prepared["bkv"])

    return out[:, :Dout]   # drop lane padding


# ----------------- pure-JAX reference (mirrors the PyTorch forward exactly) -----------------
def _reference_forward(params, input_x, input_y, seq_lens):
    B, Lk = len(seq_lens), seq_lens[0]
    Dkv = input_y.shape[-1]
    y_rec = jnp.zeros((B, Lk, Dkv), jnp.float32)
    start = 0
    for i, Li in enumerate(seq_lens):
        y_rec = y_rec.at[i, :Li].set(input_y[start:start + Li])
        start += Li
    hi = jax.lax.Precision.HIGHEST
    q = jnp.einsum("bnd,dh->bnh", input_x, params["wq"], precision=hi) + params["bq"]
    k = jnp.einsum("bld,dh->blh", y_rec, params["wk"], precision=hi) + params["bk"]
    v = jnp.einsum("bld,do->blo", y_rec, params["wv"], precision=hi) + params["bv"]
    s = jnp.einsum("bnh,blh->bnl", q, k, precision=hi)
    p = jax.nn.softmax(s, axis=-1) / math.sqrt(params["wq"].shape[1])
    att = jnp.einsum("bnl,blo->bno", p, v, precision=hi)
    return jnp.concatenate([att[i, :Li] for i, Li in enumerate(seq_lens)], axis=0)


if __name__ == "__main__":
    key = jax.random.PRNGKey(0)
    ks = jax.random.split(key, 8)

    B = 2
    seq_lens = [8, 6]                   # recover() assumes seq_lens[0] is the max
    max_len = seq_lens[0]
    total_tokens = sum(seq_lens)
    input_dim, kv_dim, hidden_dim, output_dim = 64, 48, 32, 64

    def w(k, shape, scale=0.1):
        return (scale * jax.random.normal(k, shape)).astype(jnp.float32)

    params = {
        "wq": w(ks[0], (input_dim, hidden_dim)), "bq": w(ks[1], (hidden_dim,)),
        "wk": w(ks[2], (kv_dim, hidden_dim)),    "bk": w(ks[3], (hidden_dim,)),
        "wv": w(ks[4], (kv_dim, output_dim)),    "bv": w(ks[5], (output_dim,)),
    }
    input_x = jax.random.normal(ks[6], (B, max_len, input_dim), jnp.float32)
    input_y = jax.random.normal(ks[7], (total_tokens, kv_dim), jnp.float32)

    prepared = prepare_attention_params(params)           # one-time: fuse/pad/bf16-cast weights
    fwd = jax.jit(lambda x, y: attention_intent_forward(prepared, x, y, seq_lens))

    out = fwd(input_x, input_y)
    jax.block_until_ready(out)

    assert out.shape == (total_tokens, output_dim)
    ref = _reference_forward(params, input_x, input_y, seq_lens)
    # bf16 MXU operands with f32 accumulation -> slightly looser tolerance than pure-f32.
    np.testing.assert_allclose(np.asarray(out), np.asarray(ref), rtol=2e-2, atol=2e-2)
    print("KERNEL_OK")
</pallas_src>

<mosaic_0001>
module attributes {stable_mosaic.version = 11 : i64} {
  func.func @_attention_intent_kernel(%arg0: i32, %arg1: memref<16x64xf32, #tpu.memory_space<vmem>>, %arg2: memref<14x48xf32, #tpu.memory_space<vmem>>, %arg3: memref<64x128xbf16, #tpu.memory_space<vmem>>, %arg4: memref<1x128xf32, #tpu.memory_space<vmem>>, %arg5: memref<48x256xbf16, #tpu.memory_space<vmem>>, %arg6: memref<1x256xf32, #tpu.memory_space<vmem>>, %arg7: memref<14x128xf32, #tpu.memory_space<vmem>>) attributes {dimension_semantics = [#tpu.dimension_semantics<arbitrary>], iteration_bounds = array<i64: 1>, scalar_prefetch = 0 : i64, scratch_operands = 0 : i64, tpu.core_type = #tpu.core_type<tc>, window_params = [{pipeline_mode = #tpu.pipeline_mode<synchronous>, transform_indices = @transform_0, window_bounds = array<i64: 16, 64>}, {pipeline_mode = #tpu.pipeline_mode<synchronous>, transform_indices = @transform_1, window_bounds = array<i64: 14, 48>}, {pipeline_mode = #tpu.pipeline_mode<synchronous>, transform_indices = @transform_2, window_bounds = array<i64: 64, 128>}, {pipeline_mode = #tpu.pipeline_mode<synchronous>, transform_indices = @transform_3, window_bounds = array<i64: 1, 128>}, {pipeline_mode = #tpu.pipeline_mode<synchronous>, transform_indices = @transform_4, window_bounds = array<i64: 48, 256>}, {pipeline_mode = #tpu.pipeline_mode<synchronous>, transform_indices = @transform_5, window_bounds = array<i64: 1, 256>}, {pipeline_mode = #tpu.pipeline_mode<synchronous>, transform_indices = @transform_6, window_bounds = array<i64: 14, 128>}]} {
    %c0 = arith.constant 0 : index
    %c0_0 = arith.constant 0 : index
    %0 = vector.load %arg1[%c0, %c0_0] : memref<16x64xf32, #tpu.memory_space<vmem>>, vector<16x64xf32>
    %1 = arith.truncf %0 : vector<16x64xf32> to vector<16x64xbf16>
    %c0_1 = arith.constant 0 : index
    %c0_2 = arith.constant 0 : index
    %2 = vector.load %arg3[%c0_1, %c0_2] : memref<64x128xbf16, #tpu.memory_space<vmem>>, vector<64x128xbf16>
    %cst = arith.constant dense<0.000000e+00> : vector<16x128xf32>
    %3 = tpu.matmul %1, %2, %cst {dimension_numbers = #tpu.dot_dimension_numbers<[1], [0], [0], [1], [0, 0, 1, 1], [], []>} : vector<16x64xbf16>, vector<64x128xbf16>, vector<16x128xf32> -> vector<16x128xf32>
    %c0_3 = arith.constant 0 : index
    %c0_4 = arith.constant 0 : index
    %4 = vector.load %arg4[%c0_3, %c0_4] : memref<1x128xf32, #tpu.memory_space<vmem>>, vector<1x128xf32>
    %5 = vector.broadcast %4 : vector<1x128xf32> to vector<16x128xf32>
    %6 = arith.addf %3, %5 : vector<16x128xf32>
    %c0_5 = arith.constant 0 : index
    %c0_6 = arith.constant 0 : index
    %7 = vector.load %arg2[%c0_5, %c0_6] : memref<14x48xf32, #tpu.memory_space<vmem>>, vector<14x48xf32>
    %8 = arith.truncf %7 : vector<14x48xf32> to vector<14x48xbf16>
    %c0_7 = arith.constant 0 : index
    %c0_8 = arith.constant 0 : index
    %9 = vector.load %arg5[%c0_7, %c0_8] : memref<48x256xbf16, #tpu.memory_space<vmem>>, vector<48x256xbf16>
    %cst_9 = arith.constant dense<0.000000e+00> : vector<14x256xf32>
    %10 = tpu.matmul %8, %9, %cst_9 {dimension_numbers = #tpu.dot_dimension_numbers<[1], [0], [0], [1], [0, 0, 1, 1], [], []>} : vector<14x48xbf16>, vector<48x256xbf16>, vector<14x256xf32> -> vector<14x256xf32>
    %c0_10 = arith.constant 0 : index
    %c0_11 = arith.constant 0 : index
    %11 = vector.load %arg6[%c0_10, %c0_11] : memref<1x256xf32, #tpu.memory_space<vmem>>, vector<1x256xf32>
    %12 = vector.broadcast %11 : vector<1x256xf32> to vector<14x256xf32>
    %13 = arith.addf %10, %12 : vector<14x256xf32>
    %c0_12 = arith.constant 0 : index
    %c0_13 = arith.constant 0 : index
    %14 = vector.load %arg6[%c0_12, %c0_13] : memref<1x256xf32, #tpu.memory_space<vmem>>, vector<1x256xf32>
    %15 = vector.extract_strided_slice %6 {offsets = [0, 0], sizes = [8, 128], strides = [1, 1]} : vector<16x128xf32> to vector<8x128xf32>
    %16 = vector.extract_strided_slice %13 {offsets = [0, 0], sizes = [8, 256], strides = [1, 1]} : vector<14x256xf32> to vector<8x256xf32>
    %17 = vector.extract_strided_slice %16 {offsets = [0, 0], sizes = [8, 128], strides = [1, 1]} : vector<8x256xf32> to vector<8x128xf32>
    %18 = vector.extract_strided_slice %16 {offsets = [0, 128], sizes = [8, 128], strides = [1, 1]} : vector<8x256xf32> to vector<8x128xf32>
    %19 = arith.truncf %15 : vector<8x128xf32> to vector<8x128xbf16>
    %20 = arith.truncf %17 : vector<8x128xf32> to vector<8x128xbf16>
    %cst_14 = arith.constant dense<0.000000e+00> : vector<8x8xf32>
    %21 = tpu.matmul %19, %20, %cst_14 {dimension_numbers = #tpu.dot_dimension_numbers<[1], [1], [0], [0], [0, 0, 1, 0], [], []>} : vector<8x128xbf16>, vector<8x128xbf16>, vector<8x8xf32> -> vector<8x8xf32>
    %cst_15 = arith.constant dense<0xFF800000> : vector<8xf32>
    %22 = vector.multi_reduction <maximumf>, %21, %cst_15 [1] : vector<8x8xf32> to vector<8xf32>
    %cst_16 = arith.constant 0xFF800000 : f32
    %23 = vector.broadcast %cst_16 : f32 to vector<8xf32>
    %24 = arith.maximumf %23, %22 : vector<8xf32>
    %25 = vector.shape_cast %24 : vector<8xf32> to vector<8x1xf32>
    %26 = vector.broadcast %25 : vector<8x1xf32> to vector<8x8xf32>
    %27 = arith.subf %21, %26 : vector<8x8xf32>
    %28 = math.exp %27 : vector<8x8xf32>
    %cst_17 = arith.constant dense<0.000000e+00> : vector<8xf32>
    %29 = vector.multi_reduction <add>, %28, %cst_17 [1] : vector<8x8xf32> to vector<8xf32>
    %30 = vector.shape_cast %29 : vector<8xf32> to vector<8x1xf32>
    %31 = vector.broadcast %30 : vector<8x1xf32> to vector<8x8xf32>
    %32 = arith.divf %28, %31 : vector<8x8xf32>
    %33 = arith.truncf %32 : vector<8x8xf32> to vector<8x8xbf16>
    %34 = arith.truncf %18 : vector<8x128xf32> to vector<8x128xbf16>
    %cst_18 = arith.constant dense<0.000000e+00> : vector<8x128xf32>
    %35 = tpu.matmul %33, %34, %cst_18 {dimension_numbers = #tpu.dot_dimension_numbers<[1], [0], [0], [1], [0, 0, 1, 1], [], []>} : vector<8x8xbf16>, vector<8x128xbf16>, vector<8x128xf32> -> vector<8x128xf32>
    %c0_19 = arith.constant 0 : index
    %c0_20 = arith.constant 0 : index
    %36 = vector.load %arg7[%c0_19, %c0_20] : memref<14x128xf32, #tpu.memory_space<vmem>>, vector<8x128xf32>
    tpu.vector_store %arg7[%c0_19, %c0_20], %35 {strides = array<i32>} : memref<14x128xf32, #tpu.memory_space<vmem>>, vector<8x128xf32>,
    %37 = vector.extract_strided_slice %6 {offsets = [8, 0], sizes = [6, 128], strides = [1, 1]} : vector<16x128xf32> to vector<6x128xf32>
    %38 = vector.extract_strided_slice %13 {offsets = [8, 0], sizes = [6, 256], strides = [1, 1]} : vector<14x256xf32> to vector<6x256xf32>
    %39 = vector.shape_cast %14 : vector<1x256xf32> to vector<1x256xf32>
    %40 = vector.broadcast %39 : vector<1x256xf32> to vector<2x256xf32>
    %41 = tpu.concatenate %38, %40 in 0 : vector<6x256xf32>, vector<2x256xf32> -> vector<8x256xf32>
    %42 = vector.extract_strided_slice %41 {offsets = [0, 0], sizes = [8, 128], strides = [1, 1]} : vector<8x256xf32> to vector<8x128xf32>
    %43 = vector.extract_strided_slice %41 {offsets = [0, 128], sizes = [8, 128], strides = [1, 1]} : vector<8x256xf32> to vector<8x128xf32>
    %44 = arith.truncf %37 : vector<6x128xf32> to vector<6x128xbf16>
    %45 = arith.truncf %42 : vector<8x128xf32> to vector<8x128xbf16>
    %cst_21 = arith.constant dense<0.000000e+00> : vector<6x8xf32>
    %46 = tpu.matmul %44, %45, %cst_21 {dimension_numbers = #tpu.dot_dimension_numbers<[1], [1], [0], [0], [0, 0, 1, 0], [], []>} : vector<6x128xbf16>, vector<8x128xbf16>, vector<6x8xf32> -> vector<6x8xf32>
    %cst_22 = arith.constant dense<0xFF800000> : vector<6xf32>
    %47 = vector.multi_reduction <maximumf>, %46, %cst_22 [1] : vector<6x8xf32> to vector<6xf32>
    %cst_23 = arith.constant 0xFF800000 : f32
    %48 = vector.broadcast %cst_23 : f32 to vector<6xf32>
    %49 = arith.maximumf %48, %47 : vector<6xf32>
    %50 = vector.shape_cast %49 : vector<6xf32> to vector<6x1xf32>
    %51 = vector.broadcast %50 : vector<6x1xf32> to vector<6x8xf32>
    %52 = arith.subf %46, %51 : vector<6x8xf32>
    %53 = math.exp %52 : vector<6x8xf32>
    %cst_24 = arith.constant dense<0.000000e+00> : vector<6xf32>
    %54 = vector.multi_reduction <add>, %53, %cst_24 [1] : vector<6x8xf32> to vector<6xf32>
    %55 = vector.shape_cast %54 : vector<6xf32> to vector<6x1xf32>
    %56 = vector.broadcast %55 : vector<6x1xf32> to vector<6x8xf32>
    %57 = arith.divf %53, %56 : vector<6x8xf32>
    %58 = arith.truncf %57 : vector<6x8xf32> to vector<6x8xbf16>
    %59 = arith.truncf %43 : vector<8x128xf32> to vector<8x128xbf16>
    %cst_25 = arith.constant dense<0.000000e+00> : vector<6x128xf32>
    %60 = tpu.matmul %58, %59, %cst_25 {dimension_numbers = #tpu.dot_dimension_numbers<[1], [0], [0], [1], [0, 0, 1, 1], [], []>} : vector<6x8xbf16>, vector<8x128xbf16>, vector<6x128xf32> -> vector<6x128xf32>
    %c8 = arith.constant 8 : index
    %c0_26 = arith.constant 0 : index
    %61 = vector.load %arg7[%c8, %c0_26] : memref<14x128xf32, #tpu.memory_space<vmem>>, vector<6x128xf32>
    tpu.vector_store %arg7[%c8, %c0_26], %60 {strides = array<i32>} : memref<14x128xf32, #tpu.memory_space<vmem>>, vector<6x128xf32>,
    return
  }
  func.func @transform_0(%arg0: i32) -> (i32, i32) {
    %c0_i32 = arith.constant 0 : i32
    %c0_i32_0 = arith.constant 0 : i32
    %c0_i32_1 = arith.constant 0 : i32
    return %c0_i32, %c0_i32_0 : i32, i32
  }
  func.func @transform_1(%arg0: i32) -> (i32, i32) {
    %c0_i32 = arith.constant 0 : i32
    %c0_i32_0 = arith.constant 0 : i32
    %c0_i32_1 = arith.constant 0 : i32
    return %c0_i32, %c0_i32_0 : i32, i32
  }
  func.func @transform_2(%arg0: i32) -> (i32, i32) {
    %c0_i32 = arith.constant 0 : i32
    %c0_i32_0 = arith.constant 0 : i32
    %c0_i32_1 = arith.constant 0 : i32
    return %c0_i32, %c0_i32_0 : i32, i32
  }
  func.func @transform_3(%arg0: i32) -> (i32, i32) {
    %c0_i32 = arith.constant 0 : i32
    %c0_i32_0 = arith.constant 0 : i32
    %c0_i32_1 = arith.constant 0 : i32
    return %c0_i32, %c0_i32_0 : i32, i32
  }
  func.func @transform_4(%arg0: i32) -> (i32, i32) {
    %c0_i32 = arith.constant 0 : i32
    %c0_i32_0 = arith.constant 0 : i32
    %c0_i32_1 = arith.constant 0 : i32
    return %c0_i32, %c0_i32_0 : i32, i32
  }
  func.func @transform_5(%arg0: i32) -> (i32, i32) {
    %c0_i32 = arith.constant 0 : i32
    %c0_i32_0 = arith.constant 0 : i32
    %c0_i32_1 = arith.constant 0 : i32
    return %c0_i32, %c0_i32_0 : i32, i32
  }
  func.func @transform_6(%arg0: i32) -> (i32, i32) {
    %c0_i32 = arith.constant 0 : i32
    %c0_i32_0 = arith.constant 0 : i32
    %c0_i32_1 = arith.constant 0 : i32
    return %c0_i32, %c0_i32_0 : i32, i32
  }
}

</mosaic_0001>

<bundles_post_ra>
// kernel: _lambda_.1
= control target key start
LH: loop header
LB: loop body
LE: loop exit
PB: predicated region body
PF: predicated region fallthrough
CT: control target
= control target key end

     0   :  { %v551_v1 = vmov 0.0   ;;  %v552_v3 = vmov 0   ;;  %vm553_vm0 = vmmov 0   ;;  %s680_s0 = inlined_call_operand.vmem [shape: f32[16,64], index: 0, kind: input, shape index: {}]   ;;  %s681_s1 = inlined_call_operand.vmem [shape: f32[14,48], index: 1, kind: input, shape index: {}]   ;;  %s682_s2 = inlined_call_operand.vmem [shape: bf16[64,128], index: 2, kind: input, shape index: {}]   ;;  %s683_s3 = inlined_call_operand.vmem [shape: f32[1,128], index: 3, kind: input, shape index: {}]   ;;  %s684_s4 = inlined_call_operand.vmem [shape: bf16[48,256], index: 4, kind: input, shape index: {}]   ;;  %s685_s5 = inlined_call_operand.vmem [shape: f32[1,256], index: 5, kind: input, shape index: {}]   ;;  %s686_s6 = inlined_call_operand.hbm [shape: f32[14,128], index: 6, kind: output, shape index: {}]  }
   0x1   :  { %v506_v0 = vld [vmem:[%s684_s4 + $0x4] ss:$8 sps:$4 sm:$0xff]   ;;  %464 = vmatprep.subr.bf16.mxu0 %v551_v1  ;;  %v508_v2 = vld [vmem:[%s684_s4] ss:$8 sps:$4 sm:$0xff]   ;;  %199 = vmatprep.mubr.bf16.mxu1 %v552_v3  ;;  %v510_v5 = vld [vmem:[%s684_s4 + $0x14] ss:$8 sps:$4 sm:$0xff]  }
   0x2   :  { %167 = vmatprep.subr.bf16.mxu1 %v506_v0  ;;  %v509_v4 = vld [vmem:[%s682_s2] sm:$0xff]   ;;  %v512_v6 = vld [vmem:[%s684_s4 + $0x10] ss:$8 sps:$4 sm:$0xff]   ;;  %472 = vmatprep.mubr.msk.bf16.mxu0 %vm553_vm0, %v551_v1  ;;  %v513_v7 = vld [vmem:[%s682_s2 + $0x8] sm:$0xff]  }
   0x3   :  { %168 = vmatpush1.bf16.msra.mxu1 %v508_v2  ;;  %465 = vmatpush3.bf16.msra.mxu0 %v509_v4  ;;  %v514_v8 = vld [vmem:[%s684_s4 + $0x24] ss:$8 sps:$4 sm:$0xff]   ;;  %v516_v9 = vld [vmem:[%s684_s4 + $0x20] ss:$8 sps:$4 sm:$0xff]   ;;  %v517_v12 = vld [vmem:[%s682_s2 + $0x10] sm:$0xff]  }
   0x4   :  { %169 = vmatprep.subr.bf16.mxu1 %v510_v5  ;;  %466 = vmatprep.subr.bf16.mxu0 %v551_v1  ;;  %v112_v10 = vld [vmem:[%s681_s1] sm:$0xff]  ;;  %v113_v11 = vld [vmem:[%s681_s1 + $0x8] sm:$0x3f] }
   0x7   :  { %170 = vmatpush1.bf16.msra.mxu1 %v512_v6  ;;  %467 = vmatpush3.bf16.msra.mxu0 %v513_v7 }
   0x8   :  { %171 = vmatprep.subr.bf16.mxu1 %v514_v8  ;;  %468 = vmatprep.subr.bf16.mxu0 %v551_v1 }
   0x9   :  { %11 = vsyncpa [#allocation3], 0  ;;  %v114_v13 = vpack.c.bf16 %v113_v11, %v112_v10  ;;  %vm163_vm1 = vcmask 392192   ;;  %v518_v14 = vld [vmem:[%s682_s2 + $0x18] sm:$0xff]   ;;  %v25_v15 = vld [vmem:[%s680_s0] sm:$0xff]  ;;  %vm67_vm2 = vcmask 523264   ;;  %v123_v18 = vlaneseq }
   0xa   :  { %v26_v16 = vld [vmem:[%s680_s0 + $0x8] sm:$0xff]  ;;  %v121_v21 = vld [vmem:[%s685_s5] sm:$0x3]  ;;  %vm269_vm3 = vcmask 1043456   ;;  %vm314_vm4 = vcmask 1045504   ;;  %vm252_vm5 = vcmask 64512  }
   0xb   :  { %172 = vmatpush1.bf16.msra.mxu1 %v516_v9  ;;  %469 = vmatpush3.bf16.msra.mxu0 %v517_v12  ;;  %v27_v17 = vpack.c.bf16 %v26_v16, %v25_v15  ;;  %v124_v19 = vshrl.u32 %v123_v18, 7  ;;  %v436_v32 = vld [vmem:[%s683_s3] ss:$0 sm:$0xff]  ;;  %vm359_vm6 = vcmask 62464   ;;  %s554_s3 = smov [#allocation2]  }
   0xc   :  { %476 = vmatprep.subr.bf16.mxu1 %v551_v1  ;;  %470 = vmatprep.subr.bf16.mxu0 %v551_v1  ;;  %s425_s5 = sshll.u32 %s554_s3, 4  ;;  %s426_s5 = int_to_ptr.vmem [resolvable:$true] %s425_s5 }
   0xd   :  { %v125_v20 = vsub.s32 0, %v124_v19  ;;  %v129_v22 = vsub.s32 1, %v124_v19  ;;  %s527_s25 = scalar_lea.vmem %s426_s5, 256  ;;  %p532_p1 = scmp.lt.s32.totalorder %s426_s5, %s426_s5 }
   0xe   :  { %448 = vmatmul.mubr.msk.bf16.vlgmr.msra.gmra.mrb[0].mxu1 %vm163_vm1, %v114_v13  ;;  %p528_p0 = scmp.ne.s32.totalorder %s426_s5, %s527_s25  ;;  %p533_p2 = scmp.lt.s32.totalorder %s527_s25, %s527_s25 }
   0xf   :  { %478 = vmatprep.mubr.msk.bf16.mxu1 %vm553_vm0, %v551_v1  ;;  %471 = vmatpush3.bf16.msra.mxu0 %v518_v14  ;;  %v126_v23 = vrot.slane %v121_v21, %v125_v20  ;;  %v130_v24 = vrot.slane %v121_v21, %v129_v22 }
  0x10   :  { %482 = vmatprep.subr.bf16.mxu0 %v551_v1  ;;  %p534_p3 = por %p533_p2, %p532_p1 }
  0x12   :  { %473 = vmatmul.mubr.msk.bf16.vlgmr.msra.gmra.mrb[0].mxu0 %vm67_vm2, %v27_v17  ;;  %p535_p4 = pnand %p534_p3, %p528_p0 }
  0x13   :  { %484 = vmatprep.mubr.msk.bf16.mxu0 %vm553_vm0, %v551_v1 }
  0xe1   :  { %v201_v25 = vpop.f32.mrb[0].mxu1 }
  0xe2   :  { %v202_v26 = vadd.f32 %v201_v25, %v126_v23  ;;  %v203_v27 = vpop.f32.mrb[1].mxu1 }
  0xe3   :  { %v204_v28 = vadd.f32 %v203_v27, %v130_v24  ;;  %v205_v29 = vpop.f32.mrb[2].mxu1 }
  0xe4   :  { %v211_v30 = vpack.c.bf16 %v202_v26, %v202_v26  ;;  %v207_v31 = vpop.f32.mrb[3].mxu1  ;;  %v206_v34 = vadd.f32 %v205_v29, %v126_v23 }
  0xe5   :  { %v265_v33 = vpack.c.bf16 %v204_v28, %v204_v28  ;;  %v208_v35 = vadd.f32 %v207_v31, %v130_v24  ;;  %v105_v36 = vpop.f32.mrb[0].mxu0 }
  0xe6   :  { %477 = vmatpush3.bf16.xpose.msra.mxu1 %v211_v30  ;;  %v106_v39 = vadd.f32 %v436_v32, %v105_v36  ;;  %v474_v40 = vpop.f32.mrb[1].mxu0  ;;  %v315_v43 = vsel %vm314_vm4, %v206_v34, %v126_v23 }
  0xe7   :  { %v271_v37 = vsel %vm269_vm3, %v265_v33, 0  ;;  %v316_v38 = vsel %vm314_vm4, %v208_v35, %v130_v24  ;;  %488 = vmatprep.subr.bf16.mxu1 %v551_v1  ;;  %v108_v42 = vpop.f32.mrb[2].mxu0  ;;  %v318_v47 = vpack.c.bf16 %v315_v43, %v315_v43 }
  0xe8   :  { %v372_v41 = vpack.c.bf16 %v316_v38, %v316_v38  ;;  %483 = vmatpush3.bf16.msra.mxu0 %v271_v37  ;;  %v210_v44 = vpack.c.bf16 %v106_v39, %v106_v39  ;;  %v475_v45 = vpop.f32.mrb[3].mxu0  ;;  %v109_v48 = vadd.f32 %v436_v32, %v108_v42 }
  0xe9   :  { %494 = vmatprep.subr.bf16.mxu0 %v551_v1 }
  0xea   :  { %v377_v46 = vsel %vm269_vm3, %v372_v41, 0  ;;  %v317_v49 = vpack.c.bf16 %v109_v48, %v109_v48 }
  0xed   :  { %479 = vmatmul.mubr.bf16.vlgmr.msra.gmra.mrb[4].mxu1 %v210_v44 }
  0xee   :  { %489 = vmatpush3.bf16.xpose.msra.mxu1 %v318_v47  ;;  %490 = vmatprep.mubr.msk.bf16.mxu1 %vm553_vm0, %v551_v1 }
  0xf5   :  { %491 = vmatmul.mubr.bf16.vlgmr.msra.gmra.mrb[8].mxu1 %v317_v49 }
 0x1c0   :  { %v246_v50 = vpop.f32.mrb[4].mxu1 }
 0x1c1   :  { %v480_v51 = vpop.f32.mrb[5].mxu1  ;;  %v253_v52 = vsel %vm252_vm5, %v246_v50, -inf }
 0x1c2   :  { %254 = vmax.xlane.f32.xlu0 %v253_v52  ;;  %v249_v53 = vpop.f32.mrb[6].mxu1 }
 0x1c3   :  { %v481_v54 = vpop.f32.mrb[7].mxu1 }
 0x1c8   :  { %v353_v55 = vpop.f32.mrb[8].mxu1 }
 0x1c9   :  { %v492_v56 = vpop.f32.mrb[9].mxu1  ;;  %v360_v57 = vsel %vm359_vm6, %v353_v55, -inf }
 0x1ca   :  { %361 = vmax.xlane.f32.xlu0 %v360_v57  ;;  %v356_v58 = vpop.f32.mrb[10].mxu1 }
 0x1cb   :  { %v493_v59 = vpop.f32.mrb[11].mxu1 }
 0x24f   :  { %v255_v60 = vpop.xlane.xlu0 %254 }
 0x250   :  { %v256_v61 = vsub.f32 %v246_v50, %v255_v60 }
 0x252   :  { %v257_v62 = vmul.f32 1.442695, %v256_v61 }
 0x254   :  { %519 = vpow2.f32 %v257_v62 }
 0x257   :  { %v362_v63 = vpop.xlane.xlu0 %361 }
 0x258   :  { %v363_v0 = vsub.f32 %v353_v55, %v362_v63 }
 0x25a   :  { %v364_v2 = vmul.f32 1.442695, %v363_v0 }
 0x25c   :  { %521 = vpow2.f32 %v364_v2 }
 0x25e   :  { %v520_v3 = vpop.eup %519 }
 0x25f   :  { %v259_v4 = vsel %vm252_vm5, %v520_v3, 0.0 }
 0x260   :  { %260 = vadd.xlane.f32.xlu1 %v259_v4 }
 0x266   :  { %v522_v5 = vpop.eup %521 }
 0x267   :  { %v366_v6 = vsel %vm359_vm6, %v522_v5, 0.0 }
 0x268   :  { %367 = vadd.xlane.f32.xlu1 %v366_v6 }
 0x2ed   :  { %v261_v7 = vpop.xlane.xlu1 %260 }
 0x2ee   :  { %523 = vrcp.f32 %v261_v7 }
 0x2f5   :  { %v368_v8 = vpop.xlane.xlu1 %367 }
 0x2f6   :  { %525 = vrcp.f32 %v368_v8 }
 0x2f8   :  { %v524_v9 = vpop.eup %523 }
 0x2f9   :  { %v263_v10 = vmul.f32 %v524_v9, %v520_v3 }
 0x2fb   :  { %v264_v11 = vpack.c.bf16 %v263_v10, %v263_v10 }
 0x2fd   :  { %485 = vmatmul.mubr.msk.bf16.vlgmr.msra.gmra.mrb[4].mxu0 %vm252_vm5, %v264_v11 }
 0x2fe   :  { %495 = vmatpush3.bf16.msra.mxu0 %v377_v46  ;;  %496 = vmatprep.mubr.msk.bf16.mxu0 %vm553_vm0, %v551_v1 }
 0x300   :  { %v526_v12 = vpop.eup %525 }
 0x301   :  { %v370_v13 = vmul.f32 %v526_v12, %v522_v5 }
 0x303   :  { %v371_v14 = vpack.c.bf16 %v370_v13, %v370_v13 }
 0x305   :  { %497 = vmatmul.mubr.msk.bf16.vlgmr.msra.gmra.mrb[8].mxu0 %vm252_vm5, %v371_v14 }
 0x3d0   :  { %v307_v15 = vpop.f32.mrb[4].mxu0 }
 0x3d1   :  { %313 = vst [vmem:[#allocation2] sm:$0xff] %v307_v15  ;;  %v486_v16 = vpop.f32.mrb[5].mxu0 }
 0x3d2   :  { %v310_v17 = vpop.f32.mrb[6].mxu0 }
 0x3d3   :  { %v487_v18 = vpop.f32.mrb[7].mxu0 }
 0x3d8   :  { %v413_v19 = vpop.f32.mrb[8].mxu0 }
 0x3d9   :  { %419 = vst [vmem:[#allocation2 + $0x8] sm:$0x3f] %v413_v19  ;;  %v498_v20 = vpop.f32.mrb[9].mxu0 }
 0x3da   :  { %v416_v21 = vpop.f32.mrb[10].mxu0 }
 0x3db   :  { %538 = shalt.err (!%p535_p4)
}
 0x3dc   :  { %s539_s28 = scalar_lea.hbm %s686_s6, 256 }
 0x3dd   :  { %p540_p5 = scmp.ne.s32.totalorder %s686_s6, %s539_s28  ;;  %p543_p6 = scmp.lt.u32.totalorder %s539_s28, %s686_s6 }
 0x3df   :  { %p545_p7 = pnand %p543_p6, %p540_p5 }
 0x3e1   :  { %548 = shalt.err (!%p545_p7)
}
 0x3e2   :  { %s555_s9 = smov 128   ;;  %s556_s10 = smov 8   ;;  %v499_v1 = vpop.f32.mrb[11].mxu0 }
 0x3e3   :  { %431 = dma.vmem_to_hbm [thread:$0]  %s426_s5, 256, %s686_s6, [#allocation3], %s555_s9, %s555_s9, %s556_s10  }
 0x3e4   :  { %549 = dma.done.wait [#allocation3], 256  }
 0x3e5   :  { %550 = vsyncadd [#allocation3], 4294967040 }
 0x3e6   :  { %435 = vsyncpa [#allocation3], 1 }

</bundles_post_ra>
